<compile_context>
chip_gen: v6e
topology: v6e:2x2x1
jax: 0.10.0
libtpu: 0.0.40
codegen_flags: <defaults>
</compile_context>

<pallas_src>
import functools

import jax
import jax.numpy as jnp
from jax.experimental import pallas as pl
from jax.experimental.pallas import tpu as pltpu

RELU_LEAK = 0.2
BN_EPS = 1e-5


def _round_up(x, m):
    return ((x + m - 1) // m) * m


def _vmem_limit_bytes():
    """Generation-aware scoped-VMEM budget (v5e/v6e: 128 MiB phys; v7x: 64 MiB)."""
    cap = 64 * 1024 * 1024
    try:
        info = pltpu.get_tpu_info()
        cap = int(getattr(info, "vmem_capacity_bytes", cap) or cap)
    except Exception:
        pass
    return min((cap * 3) // 4, 100 * 1024 * 1024)


# ---------------------------------------------------------------------------
# Fused path: single call, grid = (2 phases, N, spatial tiles).
#   phase 0: conv + BN statistics, conv slab resident in VMEM scratch.
#   phase 1: out = conv * scale + shift (output written once, lane-dense).
# ---------------------------------------------------------------------------
def _fused_kernel(pt_ref, wt_ref, gamma_ref, beta_ref, out_ref,
                  conv_scr, sum_scr, ssq_scr, scale_scr, shift_scr,
                  *, inv_m, n_tiles):
    ph = pl.program_id(0)
    n = pl.program_id(1)
    i = pl.program_id(2)
    idx = n * n_tiles + i            # flat tile index into the resident conv scratch

    @pl.when((ph == 0) & (n == 0) & (i == 0))
    def _init():
        sum_scr[...] = jnp.zeros_like(sum_scr)
        ssq_scr[...] = jnp.zeros_like(ssq_scr)

    @pl.when(ph == 0)
    def _conv_and_stats():
        # Conv2d(k=4, s=2) as one MXU matmul over im2col patches (bf16 in, f32 acc).
        # Conv bias intentionally omitted: training-mode BatchNorm subtracts the
        # batch mean, cancelling a constant per-channel bias exactly.
        conv = jnp.dot(wt_ref[...], pt_ref[...],
                       preferred_element_type=jnp.float32)          # [Cout, tm]
        conv_scr[idx] = conv                                          # stays in VMEM
        sum_scr[...] += jnp.sum(conv, axis=1, keepdims=True)
        ssq_scr[...] += jnp.sum(conv * conv, axis=1, keepdims=True)

    @pl.when((ph == 0)
             & (n == pl.num_programs(1) - 1)
             & (i == pl.num_programs(2) - 1))
    def _finalize_stats():
        mean = sum_scr[...] * inv_m
        # clamp avoids the (rare) negative variance from E[x^2]-mean^2 cancellation
        var = jnp.maximum(ssq_scr[...] * inv_m - mean * mean, 0.0)
        scale = jax.lax.rsqrt(var + BN_EPS) * gamma_ref[...]
        scale_scr[...] = scale
        shift_scr[...] = beta_ref[...] - mean * scale

    @pl.when(ph == 1)
    def _apply_bn():
        out_ref[...] = conv_scr[idx] * scale_scr[...] + shift_scr[...]


# ---------------------------------------------------------------------------
# Fallback 2-pass path (conv slab too big for VMEM): bf16 conv intermediate.
# ---------------------------------------------------------------------------
def _conv_stats_kernel(pt_ref, wt_ref, gamma_ref, beta_ref,
                       conv_ref, scale_ref, shift_ref,
                       sum_scr, ssq_scr, *, inv_m):
    n = pl.program_id(0)
    i = pl.program_id(1)

    @pl.when((n == 0) & (i == 0))
    def _init():
        sum_scr[...] = jnp.zeros_like(sum_scr)
        ssq_scr[...] = jnp.zeros_like(ssq_scr)

    conv = jnp.dot(wt_ref[...], pt_ref[...], preferred_element_type=jnp.float32)
    conv_ref[...] = conv.astype(conv_ref.dtype)        # bf16 intermediate to HBM
    sum_scr[...] += jnp.sum(conv, axis=1, keepdims=True)        # stats from f32
    ssq_scr[...] += jnp.sum(conv * conv, axis=1, keepdims=True)

    @pl.when((n == pl.num_programs(0) - 1) & (i == pl.num_programs(1) - 1))
    def _finalize_stats():
        mean = sum_scr[...] * inv_m
        var = jnp.maximum(ssq_scr[...] * inv_m - mean * mean, 0.0)
        scale = jax.lax.rsqrt(var + BN_EPS) * gamma_ref[...]
        scale_ref[...] = scale
        shift_ref[...] = beta_ref[...] - mean * scale


def _bn_apply_kernel(conv_ref, scale_ref, shift_ref, out_ref):
    out_ref[...] = (conv_ref[...].astype(jnp.float32) * scale_ref[...]
                    + shift_ref[...])


# ---------------------------------------------------------------------------
# Wrapper
# ---------------------------------------------------------------------------
def unet_block_forward(x_nchw, w_khkwcico, bias, gamma, beta,
                       *, stride=2, pad=1, relu=True, tm=2048,
                       force_two_pass=False):
    """Forward of UNetBlock(transposed=False, bn=True). Returns NCHW float32.

    `bias` is accepted for API parity with the PyTorch module but unused:
    training-mode BatchNorm (batch statistics) cancels a constant per-channel
    conv bias exactly. This implementation is NOT valid for eval-mode BN with
    running statistics.
    """
    del bias
    N, Cin, H, W = x_nchw.shape
    KH, KW, _, Cout = w_khkwcico.shape
    Ho = (H + 2 * pad - KH) // stride + 1
    Wo = (W + 2 * pad - KW) // stride + 1
    Sp = Ho * Wo
    M = N * Sp
    K = KH * KW * Cin

    # --- (Leaky)ReLU hoisted here: fuses with the pad/transpose/concat below,
    #     so the kernel never touches the 4x-duplicated im2col values with VALU.
    leak = 0.0 if relu else RELU_LEAK
    xa = jnp.maximum(x_nchw, 0.0) if leak == 0.0 else jnp.where(
        x_nchw > 0, x_nchw, leak * x_nchw)

    # --- im2col in batch-major, lane-dense [N, K, Sp] layout (Sp on lanes).
    # TODO(synk): im2col still duplicates each input element 4x in HBM; removing it
    # needs manual strided make_async_copy from a padded-NHWC HBM ref, which
    # BlockSpec index_maps cannot express.
    xf = jnp.transpose(xa, (0, 2, 3, 1))                                # NHWC
    xp = jnp.pad(xf, ((0, 0), (pad, pad), (pad, pad), (0, 0)))
    slabs = []
    for kh in range(KH):
        for kw in range(KW):
            s = xp[:, kh:kh + stride * Ho:stride, kw:kw + stride * Wo:stride, :]
            slabs.append(jnp.transpose(s, (0, 3, 1, 2)).reshape(N, Cin, Sp))
    # K ordered (kh, kw, ci) to match the weight flattening below.
    patches = jnp.concatenate(slabs, axis=1).astype(jnp.bfloat16)       # [N, K, Sp]

    # bf16 matmul operands (MXU-native), BN math in f32.
    wt = jnp.transpose(w_khkwcico.reshape(K, Cout)).astype(jnp.bfloat16)  # [Cout, K]
    g2 = gamma.reshape(Cout, 1).astype(jnp.float32)
    b2 = beta.reshape(Cout, 1).astype(jnp.float32)

    # --- generation/shape-aware tiling and VMEM budget.
    vmem_limit = _vmem_limit_bytes()
    per_col = 2 * (2 * K) + 2 * (4 * Cout) + 2 * (2 * Cout)   # dbl-buffered tiles/col
    tm_cap = max(128, ((int(vmem_limit * 0.4) // per_col) // 128) * 128)
    tm = max(128, min(tm, tm_cap, _round_up(Sp, 128)))
    Spp = _round_up(Sp, tm)
    if Spp > Sp:
        # zero patch columns give conv == 0 (no bias) -> add 0 to the BN sums;
        # the divisor below uses the true M, so statistics stay exact.
        patches = jnp.pad(patches, ((0, 0), (0, 0), (0, Spp - Sp)))
    n_tiles = Spp // tm
    Mp = N * Spp

    conv_scr_bytes = Cout * Mp * 4
    pipeline_bytes = per_col * tm + 2 * Cout * K * 2 + 8 * Cout * 4
    fused = (not force_two_pass) and (
        conv_scr_bytes + pipeline_bytes <= int(vmem_limit * 0.8))

    inv_m = 1.0 / M

    if fused:
        kernel = functools.partial(_fused_kernel, inv_m=inv_m, n_tiles=n_tiles)
        out3 = pl.pallas_call(
            kernel,
            out_shape=jax.ShapeDtypeStruct((N, Cout, Spp), jnp.float32),
            grid_spec=pltpu.PrefetchScalarGridSpec(
                num_scalar_prefetch=0,
                grid=(2, N, n_tiles),
                in_specs=[
                    # patch tile: pipelined in phase 0, frozen at (0,0,0) in phase 1
                    pl.BlockSpec((None, K, tm),
                                 lambda p, n, i: (n * (1 - p), 0, i * (1 - p))),
                    pl.BlockSpec((Cout, K), lambda p, n, i: (0, 0)),   # weights
                    pl.BlockSpec((Cout, 1), lambda p, n, i: (0, 0)),   # gamma
                    pl.BlockSpec((Cout, 1), lambda p, n, i: (0, 0)),   # beta
                ],
                # output block pinned at (0,0,0) during phase 0 (never flushed),
                # walks the real tiles during phase 1 -> each tile written once.
                out_specs=pl.BlockSpec((None, Cout, tm),
                                       lambda p, n, i: (n * p, 0, i * p)),
                scratch_shapes=[
                    pltpu.VMEM((N * n_tiles, Cout, tm), jnp.float32),  # conv slab
                    pltpu.VMEM((Cout, 1), jnp.float32),                # sum
                    pltpu.VMEM((Cout, 1), jnp.float32),                # sum-sq
                    pltpu.VMEM((Cout, 1), jnp.float32),                # BN scale
                    pltpu.VMEM((Cout, 1), jnp.float32),                # BN shift
                ],
            ),
            compiler_params=pltpu.CompilerParams(
                dimension_semantics=("arbitrary", "arbitrary", "arbitrary"),
                vmem_limit_bytes=vmem_limit),
            cost_estimate=pl.CostEstimate(
                flops=2 * Mp * K * Cout + 6 * Mp * Cout,
                transcendentals=Cout,
                bytes_accessed=(Mp * K * 2 + Cout * K * 2
                                + Mp * Cout * 4 + 4 * Cout * 4)),
        )(patches, wt, g2, b2)
    else:
        kernel1 = functools.partial(_conv_stats_kernel, inv_m=inv_m)
        conv_b, scale, shift = pl.pallas_call(
            kernel1,
            out_shape=(jax.ShapeDtypeStruct((N, Cout, Spp), jnp.bfloat16),
                       jax.ShapeDtypeStruct((Cout, 1), jnp.float32),
                       jax.ShapeDtypeStruct((Cout, 1), jnp.float32)),
            grid_spec=pltpu.PrefetchScalarGridSpec(
                num_scalar_prefetch=0,
                grid=(N, n_tiles),
                in_specs=[
                    pl.BlockSpec((None, K, tm), lambda n, i: (n, 0, i)),
                    pl.BlockSpec((Cout, K), lambda n, i: (0, 0)),
                    pl.BlockSpec((Cout, 1), lambda n, i: (0, 0)),
                    pl.BlockSpec((Cout, 1), lambda n, i: (0, 0)),
                ],
                out_specs=[
                    pl.BlockSpec((None, Cout, tm), lambda n, i: (n, 0, i)),
                    pl.BlockSpec((Cout, 1), lambda n, i: (0, 0)),
                    pl.BlockSpec((Cout, 1), lambda n, i: (0, 0)),
                ],
                scratch_shapes=[pltpu.VMEM((Cout, 1), jnp.float32),
                                pltpu.VMEM((Cout, 1), jnp.float32)],
            ),
            compiler_params=pltpu.CompilerParams(
                dimension_semantics=("arbitrary", "arbitrary"),
                vmem_limit_bytes=vmem_limit),
            cost_estimate=pl.CostEstimate(
                flops=2 * Mp * K * Cout + 4 * Mp * Cout,
                transcendentals=Cout,
                bytes_accessed=(Mp * K * 2 + Cout * K * 2
                                + Mp * Cout * 2 + 4 * Cout * 4)),
        )(patches, wt, g2, b2)

        out3 = pl.pallas_call(
            _bn_apply_kernel,
            out_shape=jax.ShapeDtypeStruct((N, Cout, Spp), jnp.float32),
            grid_spec=pltpu.PrefetchScalarGridSpec(
                num_scalar_prefetch=0,
                grid=(N, n_tiles),
                in_specs=[
                    pl.BlockSpec((None, Cout, tm), lambda n, i: (n, 0, i)),
                    pl.BlockSpec((Cout, 1), lambda n, i: (0, 0)),
                    pl.BlockSpec((Cout, 1), lambda n, i: (0, 0)),
                ],
                out_specs=pl.BlockSpec((None, Cout, tm), lambda n, i: (n, 0, i)),
            ),
            compiler_params=pltpu.CompilerParams(
                dimension_semantics=("parallel", "parallel"),   # 2 TCs on v7x
                vmem_limit_bytes=vmem_limit),
            cost_estimate=pl.CostEstimate(
                flops=2 * Mp * Cout, transcendentals=0,
                bytes_accessed=Mp * Cout * 2 + Mp * Cout * 4 + 2 * Cout * 4),
        )(conv_b, scale, shift)

    # Batch-major [N, Cout, Sp] -> NCHW for free (no transpose); the slice is a
    # no-op when Ho*Wo is already a multiple of 128.
    if Spp > Sp:
        out3 = out3[:, :, :Sp]
    return out3.reshape(N, Cout, Ho, Wo)


# ---------------------------------------------------------------------------
# Pure-JAX f32 reference: (Leaky)ReLU -> Conv2d(+bias) -> BatchNorm2d (batch stats)
# ---------------------------------------------------------------------------
def _reference(x_nchw, w_khkwcico, bias, gamma, beta, *, stride=2, pad=1, relu=True):
    leak = 0.0 if relu else RELU_LEAK
    xr = jnp.where(x_nchw > 0, x_nchw, leak * x_nchw)
    w_oihw = jnp.transpose(w_khkwcico, (3, 2, 0, 1))
    y = jax.lax.conv_general_dilated(
        xr, w_oihw, window_strides=(stride, stride),
        padding=((pad, pad), (pad, pad)),
        dimension_numbers=("NCHW", "OIHW", "NCHW"))
    y = y + bias[None, :, None, None]
    mean = jnp.mean(y, axis=(0, 2, 3), keepdims=True)
    var = jnp.mean((y - mean) ** 2, axis=(0, 2, 3), keepdims=True)
    yn = (y - mean) * jax.lax.rsqrt(var + BN_EPS)
    return yn * gamma[None, :, None, None] + beta[None, :, None, None]


if __name__ == "__main__":
    key = jax.random.PRNGKey(0)

    def make_params(k, cin, cout, ks):
        kw_, kb_ = jax.random.split(k)
        fan_in = cin * ks * ks
        bound = 1.0 / (fan_in ** 0.5)
        w = jax.random.uniform(kw_, (ks, ks, cin, cout), jnp.float32, -bound, bound)
        b = jax.random.uniform(kb_, (cout,), jnp.float32, -bound, bound)
        return w, b, jnp.ones((cout,), jnp.float32), jnp.zeros((cout,), jnp.float32)

    kx, kp, kx2, kp2 = jax.random.split(key, 4)

    # Config A: fused single-call path, plain ReLU, in_chans=4 -> out_chans=8,
    # batch 2, 32x32. Grid = (2 phases, 2 images, 2 spatial tiles of 128):
    # exercises cross-tile/cross-image BatchNorm accumulation and the in-VMEM
    # phase-1 BN apply.
    N, Cin, H, W, Cout, Ksz = 2, 4, 32, 32, 8, 4
    x = jax.random.normal(kx, (N, Cin, H, W), dtype=jnp.float32)
    w, b, gamma, beta = make_params(kp, Cin, Cout, Ksz)
    out = jax.block_until_ready(
        unet_block_forward(x, w, b, gamma, beta, relu=True, tm=128))
    ref = jax.block_until_ready(_reference(x, w, b, gamma, beta, relu=True))
    assert out.shape == (N, Cout, H // 2, W // 2), out.shape
    assert jnp.allclose(out, ref, rtol=5e-2, atol=5e-2), \
        float(jnp.max(jnp.abs(out - ref)))

    # Config B: forced two-pass fallback (bf16 conv intermediate), LeakyReLU path,
    # odd spatial (Ho*Wo = 81, padded to 128 lanes; stats use the true divisor).
    N2, H2, W2 = 2, 18, 18
    x2 = jax.random.normal(kx2, (N2, Cin, H2, W2), dtype=jnp.float32)
    w2, b2, gamma2, beta2 = make_params(kp2, Cin, Cout, Ksz)
    out2 = jax.block_until_ready(
        unet_block_forward(x2, w2, b2, gamma2, beta2, relu=False, tm=128,
                           force_two_pass=True))
    ref2 = jax.block_until_ready(_reference(x2, w2, b2, gamma2, beta2, relu=False))
    assert out2.shape == (N2, Cout, H2 // 2, W2 // 2), out2.shape
    assert jnp.allclose(out2, ref2, rtol=5e-2, atol=5e-2), \
        float(jnp.max(jnp.abs(out2 - ref2)))

    print("KERNEL_OK")
</pallas_src>

<mosaic_0001>
module attributes {stable_mosaic.version = 11 : i64} {
  func.func @_fused_kernel(%arg0: i32, %arg1: i32, %arg2: i32, %arg3: memref<1x64x128xbf16, #tpu.memory_space<vmem>>, %arg4: memref<8x64xbf16, #tpu.memory_space<vmem>>, %arg5: memref<8x1xf32, #tpu.memory_space<vmem>>, %arg6: memref<8x1xf32, #tpu.memory_space<vmem>>, %arg7: memref<1x8x128xf32, #tpu.memory_space<vmem>>, %arg8: memref<4x8x128xf32, #tpu.memory_space<vmem>>, %arg9: memref<8x1xf32, #tpu.memory_space<vmem>>, %arg10: memref<8x1xf32, #tpu.memory_space<vmem>>, %arg11: memref<8x1xf32, #tpu.memory_space<vmem>>, %arg12: memref<8x1xf32, #tpu.memory_space<vmem>>) attributes {dimension_semantics = [#tpu.dimension_semantics<arbitrary>, #tpu.dimension_semantics<arbitrary>, #tpu.dimension_semantics<arbitrary>], iteration_bounds = array<i64: 2, 2, 2>, scalar_prefetch = 0 : i64, scratch_operands = 5 : i64, tpu.core_type = #tpu.core_type<tc>, window_params = [{transform_indices = @transform_0, window_bounds = array<i64: 1, 64, 128>}, {pipeline_mode = #tpu.pipeline_mode<synchronous>, transform_indices = @transform_1, window_bounds = array<i64: 8, 64>}, {pipeline_mode = #tpu.pipeline_mode<synchronous>, transform_indices = @transform_2, window_bounds = array<i64: 8, 1>}, {pipeline_mode = #tpu.pipeline_mode<synchronous>, transform_indices = @transform_3, window_bounds = array<i64: 8, 1>}, {transform_indices = @transform_4, window_bounds = array<i64: 1, 8, 128>}]} {
    %c2_i32 = arith.constant 2 : i32
    %0 = arith.muli %arg1, %c2_i32 : i32
    %1 = arith.addi %0, %arg2 : i32
    %c0_i32 = arith.constant 0 : i32
    %2 = arith.cmpi eq, %arg0, %c0_i32 : i32
    %c0_i32_0 = arith.constant 0 : i32
    %3 = arith.cmpi eq, %arg1, %c0_i32_0 : i32
    %4 = arith.andi %2, %3 : i1
    %c0_i32_1 = arith.constant 0 : i32
    %5 = arith.cmpi eq, %arg2, %c0_i32_1 : i32
    %6 = arith.andi %4, %5 : i1
    %7 = arith.extui %6 : i1 to i32
    %c0_i32_2 = arith.constant 0 : i32
    %8 = arith.cmpi ne, %7, %c0_i32_2 : i32
    scf.if %8 {
      %cst = arith.constant 0.000000e+00 : f32
      %22 = vector.broadcast %cst : f32 to vector<8x1xf32>
      %c0 = arith.constant 0 : index
      %c0_10 = arith.constant 0 : index
      %23 = vector.load %arg9[%c0, %c0_10] : memref<8x1xf32, #tpu.memory_space<vmem>>, vector<8x1xf32>
      tpu.vector_store %arg9[%c0, %c0_10], %22 {strides = array<i32>} : memref<8x1xf32, #tpu.memory_space<vmem>>, vector<8x1xf32>,
      %cst_11 = arith.constant 0.000000e+00 : f32
      %24 = vector.broadcast %cst_11 : f32 to vector<8x1xf32>
      %c0_12 = arith.constant 0 : index
      %c0_13 = arith.constant 0 : index
      %25 = vector.load %arg10[%c0_12, %c0_13] : memref<8x1xf32, #tpu.memory_space<vmem>>, vector<8x1xf32>
      tpu.vector_store %arg10[%c0_12, %c0_13], %24 {strides = array<i32>} : memref<8x1xf32, #tpu.memory_space<vmem>>, vector<8x1xf32>,
    } else {
    }
    %c0_i32_3 = arith.constant 0 : i32
    %9 = arith.cmpi eq, %arg0, %c0_i32_3 : i32
    %10 = arith.extui %9 : i1 to i32
    %c0_i32_4 = arith.constant 0 : i32
    %11 = arith.cmpi ne, %10, %c0_i32_4 : i32
    scf.if %11 {
      %c0 = arith.constant 0 : index
      %c0_10 = arith.constant 0 : index
      %22 = vector.load %arg4[%c0, %c0_10] : memref<8x64xbf16, #tpu.memory_space<vmem>>, vector<8x64xbf16>
      %c0_11 = arith.constant 0 : index
      %c0_12 = arith.constant 0 : index
      %c0_13 = arith.constant 0 : index
      %23 = vector.load %arg3[%c0_11, %c0_12, %c0_13] : memref<1x64x128xbf16, #tpu.memory_space<vmem>>, vector<1x64x128xbf16>
      %24 = vector.shape_cast %23 : vector<1x64x128xbf16> to vector<64x128xbf16>
      %cst = arith.constant dense<0.000000e+00> : vector<8x128xf32>
      %25 = tpu.matmul %22, %24, %cst {dimension_numbers = #tpu.dot_dimension_numbers<[1], [0], [0], [1], [0, 0, 1, 1], [], []>} : vector<8x64xbf16>, vector<64x128xbf16>, vector<8x128xf32> -> vector<8x128xf32>
      %26 = arith.index_cast %1 : i32 to index
      %c0_14 = arith.constant 0 : index
      %c0_15 = arith.constant 0 : index
      %27 = vector.load %arg8[%26, %c0_14, %c0_15] : memref<4x8x128xf32, #tpu.memory_space<vmem>>, vector<1x8x128xf32>
      %28 = vector.shape_cast %27 : vector<1x8x128xf32> to vector<8x128xf32>
      %29 = vector.shape_cast %25 : vector<8x128xf32> to vector<1x8x128xf32>
      tpu.vector_store %arg8[%26, %c0_14, %c0_15], %29 {strides = array<i32>} : memref<4x8x128xf32, #tpu.memory_space<vmem>>, vector<1x8x128xf32>,
      %c0_16 = arith.constant 0 : index
      %c0_17 = arith.constant 0 : index
      %30 = vector.load %arg9[%c0_16, %c0_17] : memref<8x1xf32, #tpu.memory_space<vmem>>, vector<8x1xf32>
      %cst_18 = arith.constant dense<0.000000e+00> : vector<8xf32>
      %31 = vector.multi_reduction <add>, %25, %cst_18 [1] : vector<8x128xf32> to vector<8xf32>
      %32 = vector.shape_cast %31 : vector<8xf32> to vector<8x1xf32>
      %33 = arith.addf %30, %32 : vector<8x1xf32>
      %c0_19 = arith.constant 0 : index
      %c0_20 = arith.constant 0 : index
      %34 = vector.load %arg9[%c0_19, %c0_20] : memref<8x1xf32, #tpu.memory_space<vmem>>, vector<8x1xf32>
      tpu.vector_store %arg9[%c0_19, %c0_20], %33 {strides = array<i32>} : memref<8x1xf32, #tpu.memory_space<vmem>>, vector<8x1xf32>,
      %c0_21 = arith.constant 0 : index
      %c0_22 = arith.constant 0 : index
      %35 = vector.load %arg10[%c0_21, %c0_22] : memref<8x1xf32, #tpu.memory_space<vmem>>, vector<8x1xf32>
      %36 = arith.mulf %25, %25 : vector<8x128xf32>
      %cst_23 = arith.constant dense<0.000000e+00> : vector<8xf32>
      %37 = vector.multi_reduction <add>, %36, %cst_23 [1] : vector<8x128xf32> to vector<8xf32>
      %38 = vector.shape_cast %37 : vector<8xf32> to vector<8x1xf32>
      %39 = arith.addf %35, %38 : vector<8x1xf32>
      %c0_24 = arith.constant 0 : index
      %c0_25 = arith.constant 0 : index
      %40 = vector.load %arg10[%c0_24, %c0_25] : memref<8x1xf32, #tpu.memory_space<vmem>>, vector<8x1xf32>
      tpu.vector_store %arg10[%c0_24, %c0_25], %39 {strides = array<i32>} : memref<8x1xf32, #tpu.memory_space<vmem>>, vector<8x1xf32>,
    } else {
    }
    %c0_i32_5 = arith.constant 0 : i32
    %12 = arith.cmpi eq, %arg0, %c0_i32_5 : i32
    %c1_i32 = arith.constant 1 : i32
    %13 = arith.cmpi eq, %arg1, %c1_i32 : i32
    %14 = arith.andi %12, %13 : i1
    %c1_i32_6 = arith.constant 1 : i32
    %15 = arith.cmpi eq, %arg2, %c1_i32_6 : i32
    %16 = arith.andi %14, %15 : i1
    %17 = arith.extui %16 : i1 to i32
    %c0_i32_7 = arith.constant 0 : i32
    %18 = arith.cmpi ne, %17, %c0_i32_7 : i32
    scf.if %18 {
      %c0 = arith.constant 0 : index
      %c0_10 = arith.constant 0 : index
      %22 = vector.load %arg9[%c0, %c0_10] : memref<8x1xf32, #tpu.memory_space<vmem>>, vector<8x1xf32>
      %cst = arith.constant 0.001953125 : f32
      %23 = vector.broadcast %cst : f32 to vector<8x1xf32>
      %24 = arith.mulf %22, %23 : vector<8x1xf32>
      %c0_11 = arith.constant 0 : index
      %c0_12 = arith.constant 0 : index
      %25 = vector.load %arg10[%c0_11, %c0_12] : memref<8x1xf32, #tpu.memory_space<vmem>>, vector<8x1xf32>
      %cst_13 = arith.constant 0.001953125 : f32
      %26 = vector.broadcast %cst_13 : f32 to vector<8x1xf32>
      %27 = arith.mulf %25, %26 : vector<8x1xf32>
      %28 = arith.mulf %24, %24 : vector<8x1xf32>
      %29 = arith.subf %27, %28 : vector<8x1xf32>
      %cst_14 = arith.constant 0.000000e+00 : f32
      %30 = vector.broadcast %cst_14 : f32 to vector<8x1xf32>
      %31 = arith.maximumf %29, %30 : vector<8x1xf32>
      %cst_15 = arith.constant 9.99999974E-6 : f32
      %32 = vector.broadcast %cst_15 : f32 to vector<8x1xf32>
      %33 = arith.addf %31, %32 : vector<8x1xf32>
      %34 = math.rsqrt %33 : vector<8x1xf32>
      %c0_16 = arith.constant 0 : index
      %c0_17 = arith.constant 0 : index
      %35 = vector.load %arg5[%c0_16, %c0_17] : memref<8x1xf32, #tpu.memory_space<vmem>>, vector<8x1xf32>
      %36 = arith.mulf %34, %35 : vector<8x1xf32>
      %c0_18 = arith.constant 0 : index
      %c0_19 = arith.constant 0 : index
      %37 = vector.load %arg11[%c0_18, %c0_19] : memref<8x1xf32, #tpu.memory_space<vmem>>, vector<8x1xf32>
      tpu.vector_store %arg11[%c0_18, %c0_19], %36 {strides = array<i32>} : memref<8x1xf32, #tpu.memory_space<vmem>>, vector<8x1xf32>,
      %c0_20 = arith.constant 0 : index
      %c0_21 = arith.constant 0 : index
      %38 = vector.load %arg6[%c0_20, %c0_21] : memref<8x1xf32, #tpu.memory_space<vmem>>, vector<8x1xf32>
      %39 = arith.mulf %24, %36 : vector<8x1xf32>
      %40 = arith.subf %38, %39 : vector<8x1xf32>
      %c0_22 = arith.constant 0 : index
      %c0_23 = arith.constant 0 : index
      %41 = vector.load %arg12[%c0_22, %c0_23] : memref<8x1xf32, #tpu.memory_space<vmem>>, vector<8x1xf32>
      tpu.vector_store %arg12[%c0_22, %c0_23], %40 {strides = array<i32>} : memref<8x1xf32, #tpu.memory_space<vmem>>, vector<8x1xf32>,
    } else {
    }
    %c1_i32_8 = arith.constant 1 : i32
    %19 = arith.cmpi eq, %arg0, %c1_i32_8 : i32
    %20 = arith.extui %19 : i1 to i32
    %c0_i32_9 = arith.constant 0 : i32
    %21 = arith.cmpi ne, %20, %c0_i32_9 : i32
    scf.if %21 {
      %22 = arith.index_cast %1 : i32 to index
      %c0 = arith.constant 0 : index
      %c0_10 = arith.constant 0 : index
      %23 = vector.load %arg8[%22, %c0, %c0_10] : memref<4x8x128xf32, #tpu.memory_space<vmem>>, vector<1x8x128xf32>
      %24 = vector.shape_cast %23 : vector<1x8x128xf32> to vector<8x128xf32>
      %c0_11 = arith.constant 0 : index
      %c0_12 = arith.constant 0 : index
      %25 = vector.load %arg11[%c0_11, %c0_12] : memref<8x1xf32, #tpu.memory_space<vmem>>, vector<8x1xf32>
      %26 = vector.broadcast %25 : vector<8x1xf32> to vector<8x128xf32>
      %27 = arith.mulf %24, %26 : vector<8x128xf32>
      %c0_13 = arith.constant 0 : index
      %c0_14 = arith.constant 0 : index
      %28 = vector.load %arg12[%c0_13, %c0_14] : memref<8x1xf32, #tpu.memory_space<vmem>>, vector<8x1xf32>
      %29 = vector.broadcast %28 : vector<8x1xf32> to vector<8x128xf32>
      %30 = arith.addf %27, %29 : vector<8x128xf32>
      %c0_15 = arith.constant 0 : index
      %c0_16 = arith.constant 0 : index
      %c0_17 = arith.constant 0 : index
      %31 = vector.load %arg7[%c0_15, %c0_16, %c0_17] : memref<1x8x128xf32, #tpu.memory_space<vmem>>, vector<1x8x128xf32>
      %32 = vector.shape_cast %31 : vector<1x8x128xf32> to vector<8x128xf32>
      %33 = vector.shape_cast %30 : vector<8x128xf32> to vector<1x8x128xf32>
      tpu.vector_store %arg7[%c0_15, %c0_16, %c0_17], %33 {strides = array<i32>} : memref<1x8x128xf32, #tpu.memory_space<vmem>>, vector<1x8x128xf32>,
    } else {
    }
    return
  }
  func.func @transform_0(%arg0: i32, %arg1: i32, %arg2: i32) -> (i32, i32, i32) {
    %c1_i32 = arith.constant 1 : i32
    %0 = arith.subi %c1_i32, %arg0 : i32
    %1 = arith.muli %arg1, %0 : i32
    %c1_i32_0 = arith.constant 1 : i32
    %2 = arith.subi %c1_i32_0, %arg0 : i32
    %3 = arith.muli %arg2, %2 : i32
    %c0_i32 = arith.constant 0 : i32
    %c0_i32_1 = arith.constant 0 : i32
    return %1, %c0_i32, %3 : i32, i32, i32
  }
  func.func @transform_1(%arg0: i32, %arg1: i32, %arg2: i32) -> (i32, i32) {
    %c0_i32 = arith.constant 0 : i32
    %c0_i32_0 = arith.constant 0 : i32
    %c0_i32_1 = arith.constant 0 : i32
    return %c0_i32, %c0_i32_0 : i32, i32
  }
  func.func @transform_2(%arg0: i32, %arg1: i32, %arg2: i32) -> (i32, i32) {
    %c0_i32 = arith.constant 0 : i32
    %c0_i32_0 = arith.constant 0 : i32
    %c0_i32_1 = arith.constant 0 : i32
    return %c0_i32, %c0_i32_0 : i32, i32
  }
  func.func @transform_3(%arg0: i32, %arg1: i32, %arg2: i32) -> (i32, i32) {
    %c0_i32 = arith.constant 0 : i32
    %c0_i32_0 = arith.constant 0 : i32
    %c0_i32_1 = arith.constant 0 : i32
    return %c0_i32, %c0_i32_0 : i32, i32
  }
  func.func @transform_4(%arg0: i32, %arg1: i32, %arg2: i32) -> (i32, i32, i32) {
    %0 = arith.muli %arg1, %arg0 : i32
    %1 = arith.muli %arg2, %arg0 : i32
    %c0_i32 = arith.constant 0 : i32
    %c0_i32_0 = arith.constant 0 : i32
    return %0, %c0_i32, %1 : i32, i32, i32
  }
}

</mosaic_0001>

<bundles_post_ra>
// kernel: tpu_custom_call.1
= control target key start
LH: loop header
LB: loop body
LE: loop exit
PB: predicated region body
PF: predicated region fallthrough
CT: control target
= control target key end

     0   :  { %s1183_s0 = inlined_call_operand.hbm [shape: bf16[2,64,256], index: 0, kind: input, shape index: {}]   ;;  %s1184_s1 = inlined_call_operand.vmem [shape: bf16[8,64], index: 1, kind: input, shape index: {}]   ;;  %s1185_s2 = inlined_call_operand.vmem [shape: f32[8,1], index: 2, kind: input, shape index: {}]   ;;  %s1186_s3 = inlined_call_operand.vmem [shape: f32[8,1], index: 3, kind: input, shape index: {}]   ;;  %s1187_s4 = inlined_call_operand.hbm [shape: f32[2,8,256], index: 4, kind: output, shape index: {}]  }
   0x1   :  { %1195 = sst [smem:[#allocation18_spill]] %s1183_s0 }
   0x2   :  { %1196 = sst [smem:[#allocation19_spill]] %s1184_s1 }
   0x3   :  { %1197 = sst [smem:[#allocation20_spill]] %s1185_s2 }
   0x4   :  { %1198 = sst [smem:[#allocation21_spill]] %s1186_s3 }
   0x5   :  { %1199 = sst [smem:[#allocation22_spill]] %s1187_s4 }
   0x6   :  { %9 = vsyncpa [#allocation8], 0 }
   0x7   :  { %11 = vsyncpa [#allocation8 + $0x1], 0 }
   0x8   :  { %12 = vsyncpa [#allocation9], 0 }
   0x9   :  { %14 = vsyncpa [#allocation9 + $0x1], 0  ;;  %s906_s15 = smov 0   ;;  %s908_s16 = smov 0  }
   0xa   :  { %s910_s17 = smov 0   ;;  %s912_s18 = smov 0  }
   0xb   :  { %s914_s19 = smov 0   ;;  %s916_s20 = smov 0  }
   0xc   :  { %s918_s21 = smov 0   ;;  %s920_s22 = smov 0  }
   0xd   :  { %s922_s23 = smov 0   ;;  %s924_s24 = smov 0  }
   0xe   :  { %s926_s25 = smov 0   ;;  %s928_s26 = smov 0  }
   0xf   :  { %s930_s27 = smov 0  }
  0x10 LB: > { %1200 = sst [smem:[#allocation13_spill]] %s854_s23  ;;  %s532_s28 = sadd.s32 4294967295, %s870_s27   ;;  %s870_s27 = sphi %s930_s27, %s20_s27   ;;  %s866_s26 = sphi %s928_s26, %s1234_s26   ;;  %s862_s25 = sphi %s926_s25, %s1226_s25   ;;  %s858_s24 = sphi %s924_s24, %s1233_s24   ;;  %s854_s23 = sphi %s922_s23, %s1225_s23   ;;  %s850_s22 = sphi %s920_s22, %s1224_s22   ;;  %s846_s21 = sphi %s918_s21, %s1223_s21   ;;  %s842_s20 = sphi %s916_s20, %s1232_s20   ;;  %s838_s19 = sphi %s914_s19, %s1231_s19   ;;  %s834_s18 = sphi %s912_s18, %s1230_s18   ;;  %s830_s17 = sphi %s910_s17, %s1229_s17   ;;  %s826_s16 = sphi %s908_s16, %s1228_s16   ;;  %s822_s15 = sphi %s906_s15, %s1227_s15  }
  0x11   : > { %1201 = sst [smem:[#allocation14_spill]] %s858_s24  ;;  %s32_s30 = sadd.s32 1, %s858_s24 }
  0x12   : > { %1202 = sst [smem:[#allocation15_spill]] %s862_s25  ;;  %s35_s5 = sadd.s32 1, %s862_s25 }
  0x13   : > { %1203 = sst [smem:[#allocation16_spill]] %s866_s26  ;;  %p33_p0 = scmp.ge.s32.totalorder %s32_s30, 2 }
  0x14   : > { %s39_s6 = sadd.s32 1, %s866_s26  ;;  %s43_s7 = ssub.s32 1, %s866_s26 }
  0x15   : > { %s1236_s30 = smov (%p33_p0, %s32_s30), 0  ;;  %s1238_s5 = smov (!%p33_p0, %s35_s5), %s862_s25 }
  0x16   : > { %s982_s9 = smul.u32 %s862_s25, %s43_s7  ;;  %p61_p1 = scmp.ne.s32.totalorder %s842_s20, %s838_s19 }
  0x17   : > { %p37_p2 = scmp.ge.s32.totalorder %s1238_s5, 2  ;;  %s987_s10 = smul.u32 %s858_s24, %s43_s7 }
  0x18   : > { %p62_p3 = scmp.eq.s32.totalorder %s870_s27, 0  ;;  %p67_p4 = scmp.ne.s32.totalorder %s838_s19, %s834_s18 }
  0x19   : > { %s1240_s5 = smov (%p37_p2, %s1238_s5), 0  ;;  %s1242_s6 = smov (!%p37_p2, %s39_s6), %s866_s26 }
  0x1a   : > { %1204 = sst [smem:[#allocation17_spill]] %s1240_s5  ;;  %p995_p5 = por %p62_p3, %p61_p1 }
  0x1b   : > { %p68_p6 = scmp.eq.s32.totalorder %s532_s28, 0  ;;  %p41_p7 = scmp.ge.s32.totalorder %s1242_s6, 2 }
  0x1c   : > { %s140_s12 = smul.u32 %s862_s25, %s866_s26  ;;  %s149_s18 = sadd.s32 1, %s830_s17 }
  0x1d   : > { %p1003_p8 = por %p68_p6, %p67_p4  ;;  %s141_s14 = smul.u32 %s858_s24, %s866_s26 }
  0x1e   : > { %s1244_s6 = smov (%p41_p7, %s1242_s6), 0  ;;  %p159_p9 = scmp.ne.s32.totalorder %s830_s17, %s826_s16 }
  0x1f   : > { %s46_s7 = ssub.s32 1, %s1244_s6  ;;  %s142_s29 = smul.u32 %s1244_s6, %s1240_s5 }
  0x20   : > { %s47_s8 = smul.u32 %s46_s7, %s1240_s5  ;;  %p160_p10 = scmp.eq.s32.totalorder %s532_s28, 7 }
  0x21   : > { %s48_s26 = smul.u32 %s46_s7, %s1236_s30  ;;  %s144_s25 = ssub.s32 %s140_s12, %s142_s29 }
  0x22   : > { %s49_s24 = ssub.s32 %s982_s9, %s47_s8  ;;  %s143_s4 = smul.u32 %s1244_s6, %s1236_s30 }
  0x23   : > { %s50_s3 = ssub.s32 %s987_s10, %s48_s26  ;;  %p1025_p11 = por %p160_p10, %p159_p9 }
  0x24   : > { %s51_s1 = sor.u32 %s50_s3, %s49_s24  ;;  %s145_s23 = ssub.s32 %s141_s14, %s143_s4 }
  0x25   : > { %p52_p12 = scmp.eq.s32.totalorder %s51_s1, 0  ;;  %s146_s5 = sor.u32 %s145_s23, %s144_s25 }
  0x26   : > { %p147_p13 = scmp.eq.s32.totalorder %s146_s5, 0  ;;  %p165_p0 = scmp.ne.s32.totalorder %s826_s16, %s822_s15 }
  0x27   : > { %s1208_s28 = sadd.s32 1, %s842_s20  ;;  %s1209_s8 = sadd.s32 4294967294, %s870_s27  }
  0x28   : > { %s1034_s7 = scalar_select %p52_p12, %s842_s20, %s1208_s28  }
  0x29   : > { %s1037_s29 = scalar_select %p147_p13, %s830_s17, %s149_s18  }
  0x2a   : > { %p166_p1 = scmp.eq.s32.totalorder %s1209_s8, 7  ;;  %p586_p2 = scmp.lt.s32.totalorder %s870_s27, 8 }
  0x2b   : > { %s195_s26 = sand.u32 1, %s842_s20   ;;  %s537_s1 = sshll.u32 %s982_s9, 4 }
  0x2c   : > { %p1043_p3 = por %p166_p1, %p165_p0  ;;  %s536_s3 = sshll.u32 %s195_s26, 5 }
  0x2d   : > { %s207_s4 = sadd.s32 %s537_s1, %s987_s10  ;;  %s199_s24 = scalar_lea.vmem [#allocation7], %s536_s3 }
  0x2e   : > { %s538_s23 = sshll.u32 %s207_s4, 6  ;;  %s210_s25 = sshll.u32 %s199_s24, 4  ;;  %s211_s25 = int_to_ptr.vmem [resolvable:$true] %s210_s25 }
  0x2f   : > { %s1211_s0 = sld [smem:[#allocation18_spill]]  ;;  %p1054_p4 = pnand %p586_p2, %p995_p5 }
  0x30   : > { %p539_p6 = scmp.ge.s32.totalorder %s870_s27, 1  ;;  %s196_s8 = scalar_lea.sflag [#allocation8], %s195_s26 }
  0x31   : > { %p708_p7 = pneg %p1054_p4  ;;  %s719_s9 = scalar_lea.vmem %s211_s25, 512 }
  0x32   : > { %p720_p9 = scmp.ne.s32.totalorder %s211_s25, %s719_s9  ;;  %s872_s10 = smov [#allocation7]  }
  0x33   : > { %s724_s3 = sshll.u32 %s872_s10, 4  ;;  %s725_s3 = int_to_ptr.vmem [resolvable:$false] %s724_s3 }
  0x34   : > { %p722_p10 = pnand %p720_p9, %p708_p7  ;;  %s726_s1 = scalar_lea.vmem %s725_s3, 1024 }
  0x35   : > { %s209_s28 = scalar_lea.hbm %s1211_s0, %s538_s23  ;;  %p727_p13 = scmp.lt.s32.totalorder %s211_s25, %s725_s3 }
  0x36   : > { %p723_p12 = pneg %p722_p10  ;;  %p728_p0 = scmp.lt.s32.totalorder %s726_s1, %s719_s9 }
  0x38   : > { %p729_p1 = por %p728_p0, %p727_p13 }
  0x3a   : > { %p730_p5 = pnand %p729_p1, %p723_p12 }
  0x3c   : > { %733 = shalt.err (!%p730_p5)
}
  0x3d   : > { %s873_s11 = smov 128   ;;  %s874_s26 = smov 64  }
  0x3e   : > { %s875_s4 = smov 4   ;;  %p218_p2 = scmp.lt.s32.totalorder %s870_s27, 9 }
  0x3f   : > { %581 = dma.hbm_to_vmem [thread:$0]  (!%p1054_p4), %s209_s28, 512, %s211_s25, %s196_s8, %s873_s11, %s874_s26, %s875_s4  }
  0x40   : > { %p219_p7 = pnand %p539_p6, %p218_p2 }
  0x41   : > { %s224_s23 = sand.u32 (!%p219_p7), 1, %s838_s19  }
  0x42   : > { %222 = sbr.rel (%p219_p7) target bundleno = 680 (0x2a8), region = 36  ;;  %s540_s24 = sshll.u32 (!%p219_p7), %s224_s23, 5 }
  0x43   : > { %s225_s5 = scalar_lea.sflag (!%p219_p7), [#allocation8], %s224_s23  ;;  %s1067_s14 = scalar_lea.vmem (!%p219_p7), [#allocation7], %s540_s24 }
  0x47   : > { %813 = dma.done.wait (%p1003_p8), %s225_s5, 512  }
  0x48   : > { %815 = vsyncadd (%p1003_p8), %s225_s5, 4294966784  ;;  %s1213_s25 = sld [smem:[#allocation13_spill]]  ;;  %s250_s28 = sand.u32 1, %s826_s16  }
  0x49   : > { %s542_s18 = sshll.u32 %s850_s22, 1  ;;  %s1077_s8 = sshll.u32 %s250_s28, 3 }
  0x4a   : > { %s1080_s9 = sadd.s32 %s846_s21, %s542_s18  ;;  %p262_p6 = scmp.eq.s32.totalorder %s850_s22, 0 }
  0x4b   : > { %p265_p9 = scmp.eq.s32.totalorder %s846_s21, 0  ;;  %s252_s13 = scalar_lea.vmem [#allocation10], %s1077_s8 }
  0x4e   : > { %p261_p4 = scmp.eq.s32.totalorder %s1213_s25, 0 }
  0x50   : > { %p263_p8 = pnand %p262_p6, %p261_p4 }
  0x52   : > { %p264_p10 = pneg %p263_p8 }
  0x54   : > { %p266_p12 = pnand %p265_p9, %p264_p10 }
  0x56   : > { %269 = sbr.rel (%p266_p12) target bundleno = 93 (0x5d), region = 44 }
  0x5b   : > { %vm270_vm0 = vcmask 7168   ;;  %v876_v0 = vmov 0.0  }
  0x5c   : > { %271 = vst.msk [vmem:[#allocation3] sm:$0xff] %vm270_vm0, %v876_v0  ;;  %272 = vst.msk [vmem:[#allocation4] sm:$0xff] %vm270_vm0, %v876_v0 }
  0x5d PF: > { %s1214_s10 = sld [smem:[#allocation13_spill]] }
  0x63   : > { %p543_p13 = scmp.ne.s32.totalorder %s1214_s10, 0 }
  0x64   : > { %s1215_s11 = sld [smem:[#allocation19_spill]] (!%p543_p13)  ;;  %s549_s26 = sshll.u32 (!%p543_p13), %s1080_s9, 3 }
  0x65   : > { %275 = sbr.rel (%p543_p13) target bundleno = 461 (0x1cd), region = 48  ;;  %s354_s4 = scalar_lea.vmem (!%p543_p13), [#allocation2], %s549_s26 }
  0x6a   : > { %v699_v1 = vld [vmem:[%s1067_s14 + $0x18] sm:$0xff]   ;;  %v877_v2 = vmov 0.0   ;;  %v700_v3 = vld [vmem:[%s1067_s14 + $0x10] sm:$0xff]   ;;  %vm878_vm1 = vmmov 0   ;;  %v701_v4 = vld [vmem:[%s1067_s14 + $0x8] sm:$0xff]   ;;  %vm309_vm2 = vcmask 523264  }
  0x6b   : > { %562 = vmatprep.subr.bf16.mxu0 %v877_v2  ;;  %570 = vmatprep.mubr.msk.bf16.mxu0 %vm878_vm1, %v877_v2  ;;  %v702_v5 = vld [vmem:[%s1067_s14] sm:$0xff]   ;;  %vm360_vm3 = vcmask 7168   ;;  %v362_v15 = vld [vmem:[#allocation4] sm:$0xff] }
  0x6c   : > { %563 = vmatpush3.bf16.msra.mxu0 %v699_v1  ;;  %v276_v6 = vld [vmem:[%s1215_s11] sm:$0xf] }
  0x6d   : > { %564 = vmatprep.subr.bf16.mxu0 %v877_v2  ;;  %v356_v12 = vld [vmem:[#allocation3] sm:$0xff] }
  0x70   : > { %565 = vmatpush3.bf16.msra.mxu0 %v700_v3 }
  0x71   : > { %566 = vmatprep.subr.bf16.mxu0 %v877_v2 }
  0x74   : > { %567 = vmatpush3.bf16.msra.mxu0 %v701_v4 }
  0x75   : > { %568 = vmatprep.subr.bf16.mxu0 %v877_v2 }
  0x78   : > { %569 = vmatpush3.bf16.msra.mxu0 %v702_v5 }
  0x7b   : > { %571 = vmatmul.mubr.msk.bf16.vlgmr.msra.gmra.mxu0 %vm309_vm2, %v276_v6 }
 0x13b   : > { %v347_v7 = vpop.f32.mrf.mxu0 }
 0x13c   : > { %355 = vst [vmem:[%s354_s4] sm:$0xff] %v347_v7  ;;  %357 = vadd.xlane.f32.xlu0 %v347_v7  ;;  %v363_v9 = vmul.f32 %v347_v7, %v347_v7 }
 0x13d   : > { %v572_v8 = vpop.f32.mrf.mxu0 }
 0x13f   : > { %v350_v10 = vpop.f32.mrf.mxu0 }
 0x140   : > { %364 = vadd.xlane.f32.xlu0 %v363_v9 }
 0x141   : > { %v573_v11 = vpop.f32.mrf.mxu0 }
 0x1c5   : > { %v358_v13 = vpop.xlane.xlu0 %357 }
 0x1c6   : > { %v359_v14 = vadd.f32 %v358_v13, %v356_v12 }
 0x1c8   : > { %361 = vst.msk [vmem:[#allocation3] sm:$0xff] %vm360_vm3, %v359_v14 }
 0x1c9   : > { %v365_v16 = vpop.xlane.xlu0 %364 }
 0x1ca   : > { %v366_v17 = vadd.f32 %v365_v16, %v362_v15 }
 0x1cc   : > { %367 = vst.msk [vmem:[#allocation4] sm:$0xff] %vm360_vm3, %v366_v17 }
 0x1cd PF: > { %p368_p0 = scmp.eq.s32.totalorder %s850_s22, 1  ;;  %p371_p5 = scmp.eq.s32.totalorder %s846_s21, 1 }
 0x1cf   : > { %p369_p1 = pnand %p368_p0, %p261_p4 }
 0x1d1   : > { %p370_p2 = pneg %p369_p1 }
 0x1d3   : > { %p372_p7 = pnand %p371_p5, %p370_p2 }
 0x1d4   : > { %s1217_s14 = sld [smem:[#allocation20_spill]] (!%p372_p7) }
 0x1d5   : > { %375 = sbr.rel (%p372_p7) target bundleno = 506 (0x1fa), region = 52  ;;  %s1218_s10 = sld [smem:[#allocation21_spill]] (!%p372_p7) }
 0x1da   : > { %v376_v18 = vld [vmem:[#allocation3] sm:$0xff]  ;;  %v378_v19 = vld [vmem:[#allocation4] sm:$0xff]  ;;  %vm387_vm4 = vcmask 7168  }
 0x1db   : > { %v377_v20 = vmul.f32 0.001953125, %v376_v18  ;;  %v379_v21 = vmul.f32 0.001953125, %v378_v19  ;;  %v385_v26 = vld [vmem:[%s1217_s14] sm:$0xff] }
 0x1dc   : > { %v389_v29 = vld [vmem:[%s1218_s10] sm:$0xff] }
 0x1dd   : > { %v380_v22 = vmul.f32 %v377_v20, %v377_v20 }
 0x1df   : > { %v381_v23 = vsub.f32 %v379_v21, %v380_v22 }
 0x1e1   : > { %v382_v24 = vmax.f32 %v381_v23, 0.0 }
 0x1e3   : > { %v383_v25 = vadd.f32 1e-05, %v382_v24 }
 0x1e5   : > { %703 = vrsqrt.f32 %v383_v25 }
 0x1f2   : > { %v704_v27 = vpop.eup %703 }
 0x1f3   : > { %v386_v28 = vmul.f32 %v704_v27, %v385_v26 }
 0x1f5   : > { %388 = vst.msk [vmem:[#allocation5] sm:$0xff] %vm387_vm4, %v386_v28  ;;  %v390_v30 = vmul.f32 %v386_v28, %v377_v20 }
 0x1f7   : > { %v391_v31 = vsub.f32 %v389_v29, %v390_v30 }
 0x1f9   : > { %392 = vst.msk [vmem:[#allocation6] sm:$0xff] %vm387_vm4, %v391_v31 }
 0x1fa PF: > { %s1219_s3 = sld [smem:[#allocation13_spill]] }
 0x200   : > { %p550_p4 = scmp.ne.s32.totalorder %s1219_s3, 1 }
 0x201   : > { %s551_s1 = sshll.u32 (!%p550_p4), %s1080_s9, 3 }
 0x202   : > { %396 = sbr.rel (%p550_p4) target bundleno = 652 (0x28c), region = 56  ;;  %s398_s11 = scalar_lea.vmem (!%p550_p4), [#allocation2], %s551_s1 }
 0x207   : > { %v400_v32 = vld [vmem:[#allocation5] sm:$0xff]  ;;  %v879_v33 = vmov 0   ;;  %v407_v34 = vld [vmem:[#allocation6] sm:$0xff]  ;;  %v399_v36 = vld [vmem:[%s398_s11] sm:$0xff] }
 0x208   : > { %705 = vset.pattern.permute.xlu0 %v879_v33 }
 0x209   : > { %403 = vperm.xlu0 %705, %v400_v32  }
 0x20d   : > { %410 = vperm.xlu0 %705, %v407_v34  }
 0x284   : > { %v404_v35 = vpop.permute.xlu0 %403 }
 0x285   : > { %v406_v37 = vmul.f32 %v404_v35, %v399_v36 }
 0x288   : > { %v411_v38 = vpop.permute.xlu0 %410 }
 0x289   : > { %v413_v39 = vadd.f32 %v411_v38, %v406_v37 }
 0x28b   : > { %414 = vst [vmem:[%s252_s13] sm:$0xff] %v413_v39 }
 0x28c PF: > { %s1220_s26 = sld [smem:[#allocation13_spill]]  ;;  %s433_s9 = sshll.u32 %s252_s13, 4  ;;  %s434_s9 = int_to_ptr.vmem [resolvable:$true] %s433_s9 }
 0x28d   : > { %s1221_s10 = sld [smem:[#allocation22_spill]]  ;;  %s416_s1 = scalar_lea.sflag [#allocation9], %s250_s28 }
 0x28e   : > { %s734_s11 = scalar_lea.vmem %s434_s9, 128  ;;  %s880_s0 = smov [#allocation10]  }
 0x28f   : > { %p735_p6 = scmp.ne.s32.totalorder %s434_s9, %s734_s11 }
 0x291   : > { %p736_p8 = pnand %p735_p6, %p1025_p11 }
 0x292   : > { %s423_s4 = smul.u32 %s850_s22, %s1220_s26  ;;  %s738_s22 = sshll.u32 %s880_s0, 4  ;;  %s739_s22 = int_to_ptr.vmem [resolvable:$false] %s738_s22 }
 0x293   : > { %s424_s23 = smul.u32 %s846_s21, %s1220_s26  ;;  %p737_p9 = pneg %p736_p8 }
 0x294   : > { %s553_s24 = sshll.u32 %s423_s4, 1  ;;  %s740_s21 = scalar_lea.vmem %s739_s22, 256 }
 0x295   : > { %s429_s5 = sadd.s32 %s553_s24, %s424_s23  ;;  %p741_p10 = scmp.lt.s32.totalorder %s434_s9, %s739_s22 }
 0x296   : > { %s554_s14 = sshll.u32 %s429_s5, 7  ;;  %p742_p12 = scmp.lt.s32.totalorder %s740_s21, %s734_s11 }
 0x297   : > { %s431_s3 = scalar_lea.hbm %s1221_s10, %s554_s14 }
 0x298   : > { %p743_p13 = por %p742_p12, %p741_p10 }
 0x29a   : > { %p744_p0 = pnand %p743_p13, %p737_p9 }
 0x29c   : > { %747 = shalt.err (!%p744_p0)
}
 0x29d   : > { %s748_s8 = scalar_lea.hbm %s431_s3, 128  ;;  %s752_s26 = scalar_lea.hbm %s1221_s10, 512 }
 0x29e   : > { %p749_p1 = scmp.ne.s32.totalorder %s431_s3, %s748_s8  ;;  %p753_p7 = scmp.lt.s32.totalorder %s431_s3, %s1221_s10 }
 0x29f   : > { %p754_p4 = scmp.lt.s32.totalorder %s752_s26, %s748_s8 }
 0x2a0   : > { %p750_p5 = pnand %p749_p1, %p1025_p11 }
 0x2a1   : > { %p755_p6 = por %p754_p4, %p753_p7 }
 0x2a2   : > { %p751_p2 = pneg %p750_p5 }
 0x2a4   : > { %p756_p8 = pnand %p755_p6, %p751_p2 }
 0x2a6   : > { %759 = shalt.err (!%p756_p8)
}
 0x2a7   : > { %576 = dma.vmem_to_hbm [thread:$0]  (%p1025_p11), %s434_s9, 128, %s431_s3, %s416_s1  }
 0x2a8 PF: > { %p587_p9 = scmp.ge.s32.totalorder %s870_s27, 2  ;;  %s445_s0 = sand.u32 1, %s822_s15  }
 0x2a9   : > { %s446_s24 = scalar_lea.sflag [#allocation9], %s445_s0 }
 0x2aa   : > { %p583_p10 = pnand %p587_p9, %p1043_p3 }
 0x2ac   : > { %p584_p12 = pneg %p583_p10 }
 0x2ae   : > { %817 = dma.done.wait (%p584_p12), %s446_s24, 128  }
 0x2af   : > { %819 = vsyncadd (%p584_p12), %s446_s24, 4294967168  ;;  %s20_s27 = sadd.s32 1, %s870_s27   ;;  %s1223_s21 = sld [smem:[#allocation14_spill]] }
 0x2b0   : > { %p1139_p13 = scmp.ge.s32.totalorder %s20_s27, 10   ;;  %s1224_s22 = sld [smem:[#allocation15_spill]] }
 0x2b1   : > { %s1225_s23 = sld [smem:[#allocation16_spill]]  ;;  %s1227_s15 = smov %s826_s16 }
 0x2b2   : > { %s1226_s25 = sld [smem:[#allocation17_spill]]  ;;  %s1228_s16 = smov %s830_s17 }
 0x2b3   : > { %s1229_s17 = smov %s1037_s29  ;;  %s1230_s18 = smov %s838_s19 }
 0x2b4   : > { %s1231_s19 = smov %s842_s20  ;;  %s1232_s20 = smov %s1034_s7 }
 0x2b5   : > { %s1233_s24 = smov %s1236_s30  ;;  %s1234_s26 = smov %s1244_s6 }
 0x2b6   :  { %19 = sbr.rel (!%p1139_p13) target bundleno = 16 (0x10), region = 99 }
 0x2bb   :  { %451 = vsyncpa [#allocation8], 1 }
 0x2bc   :  { %453 = vsyncpa [#allocation8 + $0x1], 1 }
 0x2bd   :  { %454 = vsyncpa [#allocation9], 1 }
 0x2be   :  { %456 = vsyncpa [#allocation9 + $0x1], 1 }

</bundles_post_ra>
